<compile_context>
chip_gen: v7x
topology: tpu7x:2x2x1
jax: 0.10.0
libtpu: 0.0.40
codegen_flags: <defaults>
</compile_context>

<pallas_src>
import functools

import jax
import jax.numpy as jnp
from jax.experimental import pallas as pl
from jax.experimental.pallas import tpu as pltpu


def _latent_encoder_kernel(r_ref, wm_ref, wl_ref, bm_ref, bl_ref,
                           mean_ref, logvar_ref, acc_m, acc_l,
                           *, compute_dtype=None):
    k = pl.program_id(1)

    @pl.when(k == 0)
    def _():
        acc_m[...] = jnp.zeros_like(acc_m)
        acc_l[...] = jnp.zeros_like(acc_l)

    r = r_ref[...]
    wm = wm_ref[...]
    wl = wl_ref[...]
    if compute_dtype is not None:
        r = r.astype(compute_dtype)
        wm = wm.astype(compute_dtype)
        wl = wl.astype(compute_dtype)

    # Two MXU matmuls with f32 accumulation held in VMEM scratch across K.
    acc_m[...] += jnp.dot(r, wm, preferred_element_type=jnp.float32)
    acc_l[...] += jnp.dot(r, wl, preferred_element_type=jnp.float32)

    @pl.when(k == pl.num_programs(1) - 1)
    def _():
        mean_ref[...] = (acc_m[...] + bm_ref[...]).astype(mean_ref.dtype)
        logvar_ref[...] = (acc_l[...] + bl_ref[...]).astype(logvar_ref.dtype)


def latent_encoder(r_aggregated, w_mean, b_mean, w_logvar, b_logvar, *,
                   block_b=2048, block_k=512, compute_dtype=None):
    """Pallas equivalent of LatentEncoder.forward.

    r_aggregated: [B, r_dim]
    w_mean, w_logvar: [r_dim, z_dim]   (transposed PyTorch nn.Linear weight)
    b_mean, b_logvar: [z_dim]
    returns (z_mean, z_logvar): each [B, z_dim]
    """
    B, r_dim = r_aggregated.shape
    z_dim = w_mean.shape[1]
    dtype = r_aggregated.dtype
    itemsize = jnp.dtype(dtype).itemsize

    # dtype-dependent sublane multiple (f32 -> 8, bf16 -> 16, int8/fp8 -> 32).
    sub = {4: 8, 2: 16, 1: 32}.get(itemsize, 8)

    # --- Batch tiling: no activation padding; ragged final block is masked
    # by Pallas. ---
    tb = min(block_b, B)
    if tb < B:
        tb = max(sub, (tb // sub) * sub)
    elif B >= 2 * sub:
        # Grid would collapse to a single step: split so the "parallel" batch
        # axis has >= 2 steps and can shard across v7x's two TensorCores.
        tb = ((pl.cdiv(B, 2) + sub - 1) // sub) * sub
    nb = pl.cdiv(B, tb)

    # --- K (r_dim) tiling: only when r_dim is large AND divisible by a
    # 128-aligned tile (a ragged K block would add garbage into the
    # accumulator); otherwise keep the full K strip resident. ---
    tk = r_dim
    if r_dim > block_k:
        cand = (block_k // 128) * 128
        while cand >= 128 and r_dim % cand != 0:
            cand -= 128
        if cand >= 128:
            tk = cand
    nk = r_dim // tk

    b_mean2 = b_mean.reshape(1, z_dim)
    b_logvar2 = b_logvar.reshape(1, z_dim)

    # --- Explicit VMEM budget (double-buffered operands + f32 accumulators),
    # clamped between the largest per-chip scoped default and v7x's 64 MiB. ---
    acc_bytes = 2 * tb * z_dim * 4
    buf_bytes = 2 * tb * tk * itemsize                      # activations
    buf_bytes += 2 * 2 * tk * z_dim * itemsize              # two weights
    buf_bytes += 2 * 2 * 1 * z_dim * itemsize               # two biases
    buf_bytes += 2 * 2 * tb * z_dim * itemsize              # two outputs
    vmem_limit = int(min(max(2 * (buf_bytes + acc_bytes), 32 << 20), 60 << 20))

    cost = pl.CostEstimate(
        flops=2 * 2 * B * r_dim * z_dim,
        transcendentals=0,
        bytes_accessed=(r_aggregated.size + w_mean.size + w_logvar.size
                        + b_mean.size + b_logvar.size
                        + 2 * B * z_dim) * itemsize,
    )

    kernel = functools.partial(_latent_encoder_kernel, compute_dtype=compute_dtype)

    z_mean, z_logvar = pl.pallas_call(
        kernel,
        out_shape=(jax.ShapeDtypeStruct((B, z_dim), dtype),
                   jax.ShapeDtypeStruct((B, z_dim), dtype)),
        grid=(nb, nk),
        in_specs=[
            pl.BlockSpec((tb, tk), lambda i, k: (i, k)),     # activations
            pl.BlockSpec((tk, z_dim), lambda i, k: (k, 0)),  # w_mean (K-tiled / resident)
            pl.BlockSpec((tk, z_dim), lambda i, k: (k, 0)),  # w_logvar
            pl.BlockSpec((1, z_dim), lambda i, k: (0, 0)),   # b_mean
            pl.BlockSpec((1, z_dim), lambda i, k: (0, 0)),   # b_logvar
        ],
        out_specs=(
            pl.BlockSpec((tb, z_dim), lambda i, k: (i, 0)),
            pl.BlockSpec((tb, z_dim), lambda i, k: (i, 0)),
        ),
        scratch_shapes=[pltpu.VMEM((tb, z_dim), jnp.float32),
                        pltpu.VMEM((tb, z_dim), jnp.float32)],
        compiler_params=pltpu.CompilerParams(
            dimension_semantics=("parallel", "arbitrary"),
            vmem_limit_bytes=vmem_limit,
        ),
        cost_estimate=cost,
    )(r_aggregated, w_mean, w_logvar, b_mean2, b_logvar2)

    return z_mean, z_logvar


if __name__ == "__main__":
    key = jax.random.PRNGKey(0)
    B, r_dim, z_dim = 8, 32, 16

    k_r, k_wm, k_bm, k_wl, k_bl = jax.random.split(key, 5)
    r_aggregated = jax.random.normal(k_r, (B, r_dim), dtype=jnp.float32)

    # Deterministic synthetic parameters (shapes match nn.Linear(r_dim, z_dim)).
    # PyTorch stores weight as [z_dim, r_dim]; we keep the transposed [r_dim, z_dim].
    w_mean = jax.random.normal(k_wm, (r_dim, z_dim), dtype=jnp.float32) * 0.1
    b_mean = jax.random.normal(k_bm, (z_dim,), dtype=jnp.float32) * 0.1
    w_logvar = jax.random.normal(k_wl, (r_dim, z_dim), dtype=jnp.float32) * 0.1
    b_logvar = jax.random.normal(k_bl, (z_dim,), dtype=jnp.float32) * 0.1

    z_mean, z_logvar = latent_encoder(r_aggregated, w_mean, b_mean, w_logvar, b_logvar)
    jax.block_until_ready((z_mean, z_logvar))

    # Cross-check against plain-JAX reference.
    ref_mean = r_aggregated @ w_mean + b_mean
    ref_logvar = r_aggregated @ w_logvar + b_logvar
    assert z_mean.shape == (B, z_dim) and z_logvar.shape == (B, z_dim)
    assert jnp.allclose(z_mean, ref_mean, atol=1e-5), "mean mismatch"
    assert jnp.allclose(z_logvar, ref_logvar, atol=1e-5), "logvar mismatch"

    print("KERNEL_OK")
</pallas_src>

<mosaic_0001>
module attributes {stable_mosaic.version = 11 : i64} {
  func.func @_latent_encoder_kernel(%arg0: i32, %arg1: i32, %arg2: memref<8x32xf32, #tpu.memory_space<vmem>>, %arg3: memref<32x16xf32, #tpu.memory_space<vmem>>, %arg4: memref<32x16xf32, #tpu.memory_space<vmem>>, %arg5: memref<1x16xf32, #tpu.memory_space<vmem>>, %arg6: memref<1x16xf32, #tpu.memory_space<vmem>>, %arg7: memref<8x16xf32, #tpu.memory_space<vmem>>, %arg8: memref<8x16xf32, #tpu.memory_space<vmem>>, %arg9: memref<8x16xf32, #tpu.memory_space<vmem>>, %arg10: memref<8x16xf32, #tpu.memory_space<vmem>>) attributes {dimension_semantics = [#tpu.dimension_semantics<parallel>, #tpu.dimension_semantics<arbitrary>], iteration_bounds = array<i64: 1, 1>, scalar_prefetch = 0 : i64, scratch_operands = 2 : i64, tpu.core_type = #tpu.core_type<tc>, window_params = [{transform_indices = @transform_0, window_bounds = array<i64: 8, 32>}, {transform_indices = @transform_1, window_bounds = array<i64: 32, 16>}, {transform_indices = @transform_2, window_bounds = array<i64: 32, 16>}, {pipeline_mode = #tpu.pipeline_mode<synchronous>, transform_indices = @transform_3, window_bounds = array<i64: 1, 16>}, {pipeline_mode = #tpu.pipeline_mode<synchronous>, transform_indices = @transform_4, window_bounds = array<i64: 1, 16>}, {transform_indices = @transform_5, window_bounds = array<i64: 8, 16>}, {transform_indices = @transform_6, window_bounds = array<i64: 8, 16>}]} {
    %c0_i32 = arith.constant 0 : i32
    %0 = arith.cmpi eq, %arg1, %c0_i32 : i32
    %1 = arith.extui %0 : i1 to i32
    %c0_i32_0 = arith.constant 0 : i32
    %2 = arith.cmpi ne, %1, %c0_i32_0 : i32
    scf.if %2 {
      %cst_17 = arith.constant 0.000000e+00 : f32
      %17 = vector.broadcast %cst_17 : f32 to vector<8x16xf32>
      %c0_18 = arith.constant 0 : index
      %c0_19 = arith.constant 0 : index
      %18 = vector.load %arg9[%c0_18, %c0_19] : memref<8x16xf32, #tpu.memory_space<vmem>>, vector<8x16xf32>
      tpu.vector_store %arg9[%c0_18, %c0_19], %17 {strides = array<i32>} : memref<8x16xf32, #tpu.memory_space<vmem>>, vector<8x16xf32>,
      %cst_20 = arith.constant 0.000000e+00 : f32
      %19 = vector.broadcast %cst_20 : f32 to vector<8x16xf32>
      %c0_21 = arith.constant 0 : index
      %c0_22 = arith.constant 0 : index
      %20 = vector.load %arg10[%c0_21, %c0_22] : memref<8x16xf32, #tpu.memory_space<vmem>>, vector<8x16xf32>
      tpu.vector_store %arg10[%c0_21, %c0_22], %19 {strides = array<i32>} : memref<8x16xf32, #tpu.memory_space<vmem>>, vector<8x16xf32>,
    } else {
    }
    %c0 = arith.constant 0 : index
    %c0_1 = arith.constant 0 : index
    %3 = vector.load %arg2[%c0, %c0_1] : memref<8x32xf32, #tpu.memory_space<vmem>>, vector<8x32xf32>
    %c0_2 = arith.constant 0 : index
    %c0_3 = arith.constant 0 : index
    %4 = vector.load %arg3[%c0_2, %c0_3] : memref<32x16xf32, #tpu.memory_space<vmem>>, vector<32x16xf32>
    %c0_4 = arith.constant 0 : index
    %c0_5 = arith.constant 0 : index
    %5 = vector.load %arg4[%c0_4, %c0_5] : memref<32x16xf32, #tpu.memory_space<vmem>>, vector<32x16xf32>
    %c0_6 = arith.constant 0 : index
    %c0_7 = arith.constant 0 : index
    %6 = vector.load %arg9[%c0_6, %c0_7] : memref<8x16xf32, #tpu.memory_space<vmem>>, vector<8x16xf32>
    %cst = arith.constant dense<0.000000e+00> : vector<8x16xf32>
    %7 = tpu.matmul %3, %4, %cst {dimension_numbers = #tpu.dot_dimension_numbers<[1], [0], [0], [1], [0, 0, 1, 1], [], []>} : vector<8x32xf32>, vector<32x16xf32>, vector<8x16xf32> -> vector<8x16xf32>
    %8 = arith.addf %6, %7 : vector<8x16xf32>
    %c0_8 = arith.constant 0 : index
    %c0_9 = arith.constant 0 : index
    %9 = vector.load %arg9[%c0_8, %c0_9] : memref<8x16xf32, #tpu.memory_space<vmem>>, vector<8x16xf32>
    tpu.vector_store %arg9[%c0_8, %c0_9], %8 {strides = array<i32>} : memref<8x16xf32, #tpu.memory_space<vmem>>, vector<8x16xf32>,
    %c0_10 = arith.constant 0 : index
    %c0_11 = arith.constant 0 : index
    %10 = vector.load %arg10[%c0_10, %c0_11] : memref<8x16xf32, #tpu.memory_space<vmem>>, vector<8x16xf32>
    %cst_12 = arith.constant dense<0.000000e+00> : vector<8x16xf32>
    %11 = tpu.matmul %3, %5, %cst_12 {dimension_numbers = #tpu.dot_dimension_numbers<[1], [0], [0], [1], [0, 0, 1, 1], [], []>} : vector<8x32xf32>, vector<32x16xf32>, vector<8x16xf32> -> vector<8x16xf32>
    %12 = arith.addf %10, %11 : vector<8x16xf32>
    %c0_13 = arith.constant 0 : index
    %c0_14 = arith.constant 0 : index
    %13 = vector.load %arg10[%c0_13, %c0_14] : memref<8x16xf32, #tpu.memory_space<vmem>>, vector<8x16xf32>
    tpu.vector_store %arg10[%c0_13, %c0_14], %12 {strides = array<i32>} : memref<8x16xf32, #tpu.memory_space<vmem>>, vector<8x16xf32>,
    %c0_i32_15 = arith.constant 0 : i32
    %14 = arith.cmpi eq, %arg1, %c0_i32_15 : i32
    %15 = arith.extui %14 : i1 to i32
    %c0_i32_16 = arith.constant 0 : i32
    %16 = arith.cmpi ne, %15, %c0_i32_16 : i32
    scf.if %16 {
      %c0_17 = arith.constant 0 : index
      %c0_18 = arith.constant 0 : index
      %17 = vector.load %arg9[%c0_17, %c0_18] : memref<8x16xf32, #tpu.memory_space<vmem>>, vector<8x16xf32>
      %c0_19 = arith.constant 0 : index
      %c0_20 = arith.constant 0 : index
      %18 = vector.load %arg5[%c0_19, %c0_20] : memref<1x16xf32, #tpu.memory_space<vmem>>, vector<1x16xf32>
      %19 = vector.broadcast %18 : vector<1x16xf32> to vector<8x16xf32>
      %20 = arith.addf %17, %19 : vector<8x16xf32>
      %c0_21 = arith.constant 0 : index
      %c0_22 = arith.constant 0 : index
      %21 = vector.load %arg7[%c0_21, %c0_22] : memref<8x16xf32, #tpu.memory_space<vmem>>, vector<8x16xf32>
      tpu.vector_store %arg7[%c0_21, %c0_22], %20 {strides = array<i32>} : memref<8x16xf32, #tpu.memory_space<vmem>>, vector<8x16xf32>,
      %c0_23 = arith.constant 0 : index
      %c0_24 = arith.constant 0 : index
      %22 = vector.load %arg10[%c0_23, %c0_24] : memref<8x16xf32, #tpu.memory_space<vmem>>, vector<8x16xf32>
      %c0_25 = arith.constant 0 : index
      %c0_26 = arith.constant 0 : index
      %23 = vector.load %arg6[%c0_25, %c0_26] : memref<1x16xf32, #tpu.memory_space<vmem>>, vector<1x16xf32>
      %24 = vector.broadcast %23 : vector<1x16xf32> to vector<8x16xf32>
      %25 = arith.addf %22, %24 : vector<8x16xf32>
      %c0_27 = arith.constant 0 : index
      %c0_28 = arith.constant 0 : index
      %26 = vector.load %arg8[%c0_27, %c0_28] : memref<8x16xf32, #tpu.memory_space<vmem>>, vector<8x16xf32>
      tpu.vector_store %arg8[%c0_27, %c0_28], %25 {strides = array<i32>} : memref<8x16xf32, #tpu.memory_space<vmem>>, vector<8x16xf32>,
    } else {
    }
    return
  }
  func.func @transform_0(%arg0: i32, %arg1: i32) -> (i32, i32) {
    %c0_i32 = arith.constant 0 : i32
    return %arg0, %arg1 : i32, i32
  }
  func.func @transform_1(%arg0: i32, %arg1: i32) -> (i32, i32) {
    %c0_i32 = arith.constant 0 : i32
    %c0_i32_0 = arith.constant 0 : i32
    return %arg1, %c0_i32 : i32, i32
  }
  func.func @transform_2(%arg0: i32, %arg1: i32) -> (i32, i32) {
    %c0_i32 = arith.constant 0 : i32
    %c0_i32_0 = arith.constant 0 : i32
    return %arg1, %c0_i32 : i32, i32
  }
  func.func @transform_3(%arg0: i32, %arg1: i32) -> (i32, i32) {
    %c0_i32 = arith.constant 0 : i32
    %c0_i32_0 = arith.constant 0 : i32
    %c0_i32_1 = arith.constant 0 : i32
    return %c0_i32, %c0_i32_0 : i32, i32
  }
  func.func @transform_4(%arg0: i32, %arg1: i32) -> (i32, i32) {
    %c0_i32 = arith.constant 0 : i32
    %c0_i32_0 = arith.constant 0 : i32
    %c0_i32_1 = arith.constant 0 : i32
    return %c0_i32, %c0_i32_0 : i32, i32
  }
  func.func @transform_5(%arg0: i32, %arg1: i32) -> (i32, i32) {
    %c0_i32 = arith.constant 0 : i32
    %c0_i32_0 = arith.constant 0 : i32
    return %arg0, %c0_i32 : i32, i32
  }
  func.func @transform_6(%arg0: i32, %arg1: i32) -> (i32, i32) {
    %c0_i32 = arith.constant 0 : i32
    %c0_i32_0 = arith.constant 0 : i32
    return %arg0, %c0_i32 : i32, i32
  }
}

</mosaic_0001>

<bundles_post_ra>
// kernel: tpu_custom_call.1
= control target key start
LH: loop header
LB: loop body
LE: loop exit
PB: predicated region body
PF: predicated region fallthrough
CT: control target
= control target key end

     0   :  { %12 = vsyncpa [#allocation5], 0  ;;  %vm28_vm0 = vcmask 130048   ;;  %v343_v3 = vmov 0.0|0.0   ;;  %v344_v8 = vmov 0.0   ;;  %vm345_vm1 = vmmov 0   ;;  %s446_s0 = inlined_call_operand.vmem [shape: f32[8,32], index: 0, kind: input, shape index: {}]   ;;  %s447_s1 = inlined_call_operand.vmem [shape: f32[32,16], index: 1, kind: input, shape index: {}]   ;;  %s448_s2 = inlined_call_operand.vmem [shape: f32[32,16], index: 2, kind: input, shape index: {}]   ;;  %s449_s3 = inlined_call_operand.vmem [shape: f32[1,16], index: 3, kind: input, shape index: {}]   ;;  %s450_s4 = inlined_call_operand.vmem [shape: f32[1,16], index: 4, kind: input, shape index: {}]   ;;  %s451_s5 = inlined_call_operand.hbm [shape: f32[8,16], index: 5, kind: output, shape index: {0}]   ;;  %s452_s6 = inlined_call_operand.hbm [shape: f32[8,16], index: 6, kind: output, shape index: {1}]  }
   0x1   :  { %v32_v0 = vld [vmem:[%s447_s1] sm:$0xff]  ;;  %v33_v1 = vld [vmem:[%s447_s1 + $0x8] sm:$0xff]  ;;  %278 = vmatprep.subr.bf16.mxu0 %v343_v3  ;;  %284 = vmatprep.subr.bf16.mxu1 %v343_v3  ;;  %v34_v6 = vld [vmem:[%s447_s1 + $0x10] sm:$0xff]  ;;  %29 = vst.msk [vmem:[#allocation2] sm:$0xff] %vm28_vm0, %v344_v8 }
   0x2   :  { %v36_v2 = vld [vmem:[%s448_s2] sm:$0xff]  ;;  %v279_v4 = vpack.c.bf16 %v33_v1, %v32_v0  ;;  %v37_v5 = vld [vmem:[%s448_s2 + $0x8] sm:$0xff]  ;;  %v35_v7 = vld [vmem:[%s447_s1 + $0x18] sm:$0xff]  ;;  %30 = vst.msk [vmem:[#allocation3] sm:$0xff] %vm28_vm0, %v344_v8  ;;  %264 = vmatprep.mubr.msk.f32.mxu0 %vm345_vm1, %v344_v8  ;;  %275 = vmatprep.mubr.msk.f32.mxu1 %vm345_vm1, %v344_v8 }
   0x3   :  { %v285_v9 = vpack.c.bf16 %v37_v5, %v36_v2  ;;  %v38_v10 = vld [vmem:[%s448_s2 + $0x10] sm:$0xff]  ;;  %v39_v11 = vld [vmem:[%s448_s2 + $0x18] sm:$0xff]  ;;  %v282_v12 = vpack.c.bf16 %v35_v7, %v34_v6 }
   0x4   :  { %280 = vmatpush3.bf16.msra.mxu0 %v279_v4 }
   0x5   :  { %13 = vsyncpa [#allocation7], 0  ;;  %286 = vmatpush3.bf16.msra.mxu1 %v285_v9  ;;  %281 = vmatprep.subr.bf16.mxu0 %v343_v3  ;;  %v288_v13 = vpack.c.bf16 %v39_v11, %v38_v10  ;;  %v31_v14 = vld [vmem:[%s446_s0] sm:$0xff]  ;;  %vm41_vm2 = vcmask 261120   ;;  %s346_s0 = smov [#allocation4]   ;;  %s347_s18 = smov [#allocation6]  }
   0x6   :  { %287 = vmatprep.subr.bf16.mxu1 %v343_v3  ;;  %v244_v23 = vld [vmem:[%s449_s3] ss:$0 sm:$0xff]  ;;  %s220_s15 = sshll.u32 %s346_s0, 4  ;;  %s230_s19 = sshll.u32 %s347_s18, 4  ;;  %s221_s15 = int_to_ptr.vmem [resolvable:$true] %s220_s15  ;;  %s231_s19 = int_to_ptr.vmem [resolvable:$true] %s230_s19 }
   0x7   :  { %v245_v24 = vld [vmem:[%s450_s4] ss:$0 sm:$0xff]  ;;  %s295_s20 = scalar_lea.vmem %s221_s15, 128  ;;  %p300_p1 = scmp.lt.s32.totalorder %s221_s15, %s221_s15 }
   0x8   :  { %283 = vmatpush3.bf16.msra.mxu0 %v282_v12  ;;  %v40_v15 = vld [vmem:[#allocation2] sm:$0xff]  ;;  %p296_p0 = scmp.ne.s32.totalorder %s221_s15, %s295_s20  ;;  %p301_p2 = scmp.lt.s32.totalorder %s295_s20, %s295_s20 }
   0x9   :  { %289 = vmatpush3.bf16.msra.mxu1 %v288_v13  ;;  %v118_v16 = vld [vmem:[#allocation3] sm:$0xff] }
   0xa   :  { %p302_p3 = por %p301_p2, %p300_p1 }
   0xb   :  { %265 = vmatmul.mubr.msk.f32.vlgmr.msra.gmra.mrb[0].mxu0 %vm41_vm2, %v31_v14 }
   0xc   :  { %276 = vmatmul.mubr.msk.f32.vlgmr.msra.gmra.mrb[0].mxu1 %vm41_vm2, %v31_v14  ;;  %p303_p4 = pnand %p302_p3, %p296_p0 }
  0xde   :  { %v111_v17 = vpop.f32.mrb[0].mxu0 }
  0xdf   :  { %v115_v18 = vadd.f32 %v111_v17, %v40_v15  ;;  %v185_v19 = vpop.f32.mrb[0].mxu1  ;;  %v266_v20 = vpop.f32.mrb[1].mxu0 }
  0xe0   :  { %v189_v21 = vadd.f32 %v185_v19, %v118_v16  ;;  %v277_v22 = vpop.f32.mrb[1].mxu1 }
  0xe1   :  { %117 = vst.msk [vmem:[#allocation2] sm:$0xff] %vm28_vm0, %v115_v18 }
  0xe2   :  { %190 = vst.msk [vmem:[#allocation3] sm:$0xff] %vm28_vm0, %v189_v21 }
  0xe8   :  { %v194_v25 = vld [vmem:[#allocation2] sm:$0xff] }
  0xe9   :  { %v202_v26 = vadd.f32 %v244_v23, %v194_v25  ;;  %v204_v27 = vld [vmem:[#allocation3] sm:$0xff] }
  0xea   :  { %v212_v28 = vadd.f32 %v245_v24, %v204_v27 }
  0xeb   :  { %203 = vst.msk [vmem:[#allocation4] sm:$0xff] %vm28_vm0, %v202_v26 }
  0xec   :  { %306 = shalt.err (!%p303_p4)
}
  0xed   :  { %s307_s4 = scalar_lea.hbm %s451_s5, 128 }
  0xee   :  { %p308_p5 = scmp.ne.s32.totalorder %s451_s5, %s307_s4  ;;  %p311_p6 = scmp.lt.u32.totalorder %s307_s4, %s451_s5 }
  0xf0   :  { %p313_p7 = pnand %p311_p6, %p308_p5 }
  0xf2   :  { %316 = shalt.err (!%p313_p7)
}
  0xf3   :  { %223 = dma.vmem_to_hbm [thread:$0]  %s221_s15, 128, %s451_s5, [#allocation5]   ;;  %213 = vst.msk [vmem:[#allocation6] sm:$0xff] %vm28_vm0, %v212_v28 }
  0xf4   :  { %s317_s28 = scalar_lea.vmem %s231_s19, 128  ;;  %p322_p9 = scmp.lt.s32.totalorder %s231_s19, %s231_s19 }
  0xf5   :  { %p318_p8 = scmp.ne.s32.totalorder %s231_s19, %s317_s28  ;;  %p323_p10 = scmp.lt.s32.totalorder %s317_s28, %s317_s28 }
  0xf7   :  { %p324_p11 = por %p323_p10, %p322_p9 }
  0xf9   :  { %p325_p12 = pnand %p324_p11, %p318_p8 }
  0xfb   :  { %328 = shalt.err (!%p325_p12)
}
  0xfc   :  { %s329_s7 = scalar_lea.hbm %s452_s6, 128 }
  0xfd   :  { %p330_p13 = scmp.ne.s32.totalorder %s452_s6, %s329_s7  ;;  %p333_p0 = scmp.lt.u32.totalorder %s329_s7, %s452_s6 }
  0xff   :  { %p335_p1 = pnand %p333_p0, %p330_p13 }
 0x101   :  { %338 = shalt.err (!%p335_p1)
}
 0x102   :  { %233 = dma.vmem_to_hbm [thread:$0]  %s231_s19, 128, %s452_s6, [#allocation7]  }
 0x103   :  { %339 = dma.done.wait [#allocation5], 128  }
 0x104   :  { %340 = vsyncadd [#allocation5], 4294967168 }
 0x105   :  { %341 = dma.done.wait [#allocation7], 128  }
 0x106   :  { %342 = vsyncadd [#allocation7], 4294967168 }
 0x107   :  { %240 = vsyncpa [#allocation5], 1 }
 0x108   :  { %241 = vsyncpa [#allocation7], 1 }

</bundles_post_ra>
